<compile_context>
chip_gen: v7x
topology: tpu7x:2x2x1
jax: 0.10.0
libtpu: 0.0.40
codegen_flags: <defaults>
</compile_context>

<pallas_src>
import jax
import jax.numpy as jnp
from jax.experimental import pallas as pl
from jax.experimental.pallas import tpu as pltpu

# -------------------- small, module-consistent sizes --------------------
VOCAB   = 32      # emb_matrix rows
EMB_DIM = 128     # emb_matrix cols (lane-dense: multiple of 128)
SEQ_LEN = 8
BATCH   = 2

_SUBLANE    = 8
_TOKEN_TILE = 256     # max flattened tokens handled per grid step
_VOCAB_TILE = 512     # max vocab rows resident per grid step


def _round_up(x, m):
    return ((x + m - 1) // m) * m


# ----------------------------- Pallas kernel -----------------------------
def _embedding_kernel(ids_ref, table_ref, out_ref, acc_ref):
    """Gather rows of `table` at `ids` via a one-hot matmul on the MXU.

    ids_ref  : (TN, 1)  int32    (VMEM)  token-id tile
    table_ref: (TV, E)  float    (VMEM)  vocab tile k of the embedding table
    out_ref  : (TN, E)  float    (VMEM)  resident across the vocab axis
    acc_ref  : (TN, E)  float32  (VMEM scratch) accumulator over vocab tiles
    """
    k = pl.program_id(1)
    tn = out_ref.shape[0]
    tv = table_ref.shape[0]

    @pl.when(k == 0)
    def _():
        acc_ref[...] = jnp.zeros_like(acc_ref)

    ids = ids_ref[...]                                             # (TN, 1)
    iota = jax.lax.broadcasted_iota(jnp.int32, (tn, tv), 1) + k * tv
    onehot = (iota == ids).astype(table_ref.dtype)                 # (TN, TV)
    acc_ref[...] += jnp.dot(
        onehot, table_ref[...], preferred_element_type=jnp.float32)

    @pl.when(k == pl.num_programs(1) - 1)
    def _():
        out_ref[...] = acc_ref[...].astype(out_ref.dtype)


# ------------------------------ wrapper ------------------------------
def embedding_forward(emb_matrix, input_ids):
    """Pallas equivalent of Embedding.forward: emb_matrix[input_ids].

    emb_matrix: (V, E) float array (the pretrained matrix handed to __init__)
    input_ids : integer array of any shape
    returns   : array of shape input_ids.shape + (E,), dtype of emb_matrix
    """
    v, e = emb_matrix.shape
    in_shape = input_ids.shape
    flat_ids = input_ids.reshape(-1).astype(jnp.int32)
    n = flat_ids.shape[0]

    # Tile the flattened token axis; obey the (8, 128) sublane/lane rule.
    n_pad = _round_up(max(n, _SUBLANE), _SUBLANE)
    tn = min(_TOKEN_TILE, n_pad)
    n_pad = _round_up(n_pad, tn)

    # Tile the vocab axis so huge tables never need to be VMEM-resident at once.
    v_pad = _round_up(v, _SUBLANE)
    tv = min(_VOCAB_TILE, v_pad)
    v_pad = _round_up(v_pad, tv)

    ids2d = jnp.pad(flat_ids, (0, n_pad - n)).reshape(n_pad, 1)
    table = emb_matrix if v_pad == v else jnp.pad(
        emb_matrix, ((0, v_pad - v), (0, 0)))

    out = pl.pallas_call(
        _embedding_kernel,
        out_shape=jax.ShapeDtypeStruct((n_pad, e), emb_matrix.dtype),
        grid_spec=pltpu.PrefetchScalarGridSpec(
            num_scalar_prefetch=0,
            grid=(n_pad // tn, v_pad // tv),
            in_specs=[
                pl.BlockSpec((tn, 1), lambda i, k: (i, 0)),   # token ids tile
                pl.BlockSpec((tv, e), lambda i, k: (k, 0)),   # vocab tile
            ],
            out_specs=pl.BlockSpec((tn, e), lambda i, k: (i, 0)),
            scratch_shapes=[pltpu.VMEM((tn, e), jnp.float32)],
        ),
        compiler_params=pltpu.CompilerParams(
            # token tiles independent (megacore); vocab axis is a reduction.
            dimension_semantics=("parallel", "arbitrary")),
    )(ids2d, table)

    return out[:n].reshape(*in_shape, e)


# ------------------------------- main -------------------------------
if __name__ == "__main__":
    key = jax.random.PRNGKey(0)
    k_emb, k_ids = jax.random.split(key)

    # Pretrained embedding matrix (as handed to Embedding.__init__ via numpy).
    emb_matrix = jax.random.normal(k_emb, (VOCAB, EMB_DIM), jnp.float32)
    input_ids = jax.random.randint(
        k_ids, (SEQ_LEN, BATCH), 0, VOCAB, dtype=jnp.int32)

    out = jax.jit(embedding_forward)(emb_matrix, input_ids)
    jax.block_until_ready(out)

    # Reference: plain XLA gather (what nn.Embedding computes).
    ref = jnp.take(emb_matrix, input_ids, axis=0)
    assert out.shape == (SEQ_LEN, BATCH, EMB_DIM)
    assert out.dtype == emb_matrix.dtype
    assert bool(jnp.all(jnp.abs(out - ref) < 1e-5))
    assert bool(jnp.all(jnp.isfinite(out)))

    print("KERNEL_OK")
</pallas_src>

<mosaic_0001>
module attributes {stable_mosaic.version = 11 : i64} {
  func.func @_embedding_kernel(%arg0: i32, %arg1: i32, %arg2: memref<16x1xi32, #tpu.memory_space<vmem>>, %arg3: memref<32x128xf32, #tpu.memory_space<vmem>>, %arg4: memref<16x128xf32, #tpu.memory_space<vmem>>, %arg5: memref<16x128xf32, #tpu.memory_space<vmem>>) attributes {dimension_semantics = [#tpu.dimension_semantics<parallel>, #tpu.dimension_semantics<arbitrary>], iteration_bounds = array<i64: 1, 1>, scalar_prefetch = 0 : i64, scratch_operands = 1 : i64, tpu.core_type = #tpu.core_type<tc>, window_params = [{transform_indices = @transform_0, window_bounds = array<i64: 16, 1>}, {transform_indices = @transform_1, window_bounds = array<i64: 32, 128>}, {transform_indices = @transform_2, window_bounds = array<i64: 16, 128>}]} {
    %c0_i32 = arith.constant 0 : i32
    %0 = arith.cmpi eq, %arg1, %c0_i32 : i32
    %1 = arith.extui %0 : i1 to i32
    %c0_i32_0 = arith.constant 0 : i32
    %2 = arith.cmpi ne, %1, %c0_i32_0 : i32
    scf.if %2 {
      %cst_10 = arith.constant 0.000000e+00 : f32
      %20 = vector.broadcast %cst_10 : f32 to vector<16x128xf32>
      %c0_11 = arith.constant 0 : index
      %c0_12 = arith.constant 0 : index
      %21 = vector.load %arg5[%c0_11, %c0_12] : memref<16x128xf32, #tpu.memory_space<vmem>>, vector<16x128xf32>
      tpu.vector_store %arg5[%c0_11, %c0_12], %20 {strides = array<i32>} : memref<16x128xf32, #tpu.memory_space<vmem>>, vector<16x128xf32>,
    } else {
    }
    %c0 = arith.constant 0 : index
    %c0_1 = arith.constant 0 : index
    %3 = vector.load %arg2[%c0, %c0_1] : memref<16x1xi32, #tpu.memory_space<vmem>>, vector<16x1xi32>
    %4 = tpu.iota {dimensions = array<i32: 1>} : vector<16x32xi32>
    %c32_i32 = arith.constant 32 : i32
    %5 = arith.muli %arg1, %c32_i32 : i32
    %6 = vector.broadcast %5 : i32 to vector<16x32xi32>
    %7 = arith.addi %4, %6 : vector<16x32xi32>
    %8 = vector.broadcast %3 : vector<16x1xi32> to vector<16x32xi32>
    %9 = arith.cmpi eq, %7, %8 : vector<16x32xi32>
    %10 = arith.extui %9 : vector<16x32xi1> to vector<16x32xi32>
    %11 = arith.sitofp %10 : vector<16x32xi32> to vector<16x32xf32>
    %c0_2 = arith.constant 0 : index
    %c0_3 = arith.constant 0 : index
    %12 = vector.load %arg5[%c0_2, %c0_3] : memref<16x128xf32, #tpu.memory_space<vmem>>, vector<16x128xf32>
    %c0_4 = arith.constant 0 : index
    %c0_5 = arith.constant 0 : index
    %13 = vector.load %arg3[%c0_4, %c0_5] : memref<32x128xf32, #tpu.memory_space<vmem>>, vector<32x128xf32>
    %cst = arith.constant dense<0.000000e+00> : vector<16x128xf32>
    %14 = tpu.matmul %11, %13, %cst {dimension_numbers = #tpu.dot_dimension_numbers<[1], [0], [0], [1], [0, 0, 1, 1], [], []>} : vector<16x32xf32>, vector<32x128xf32>, vector<16x128xf32> -> vector<16x128xf32>
    %15 = arith.addf %12, %14 : vector<16x128xf32>
    %c0_6 = arith.constant 0 : index
    %c0_7 = arith.constant 0 : index
    %16 = vector.load %arg5[%c0_6, %c0_7] : memref<16x128xf32, #tpu.memory_space<vmem>>, vector<16x128xf32>
    tpu.vector_store %arg5[%c0_6, %c0_7], %15 {strides = array<i32>} : memref<16x128xf32, #tpu.memory_space<vmem>>, vector<16x128xf32>,
    %c0_i32_8 = arith.constant 0 : i32
    %17 = arith.cmpi eq, %arg1, %c0_i32_8 : i32
    %18 = arith.extui %17 : i1 to i32
    %c0_i32_9 = arith.constant 0 : i32
    %19 = arith.cmpi ne, %18, %c0_i32_9 : i32
    scf.if %19 {
      %c0_10 = arith.constant 0 : index
      %c0_11 = arith.constant 0 : index
      %20 = vector.load %arg5[%c0_10, %c0_11] : memref<16x128xf32, #tpu.memory_space<vmem>>, vector<16x128xf32>
      %c0_12 = arith.constant 0 : index
      %c0_13 = arith.constant 0 : index
      %21 = vector.load %arg4[%c0_12, %c0_13] : memref<16x128xf32, #tpu.memory_space<vmem>>, vector<16x128xf32>
      tpu.vector_store %arg4[%c0_12, %c0_13], %20 {strides = array<i32>} : memref<16x128xf32, #tpu.memory_space<vmem>>, vector<16x128xf32>,
    } else {
    }
    return
  }
  func.func @transform_0(%arg0: i32, %arg1: i32) -> (i32, i32) {
    %c0_i32 = arith.constant 0 : i32
    %c0_i32_0 = arith.constant 0 : i32
    return %arg0, %c0_i32 : i32, i32
  }
  func.func @transform_1(%arg0: i32, %arg1: i32) -> (i32, i32) {
    %c0_i32 = arith.constant 0 : i32
    %c0_i32_0 = arith.constant 0 : i32
    return %arg1, %c0_i32 : i32, i32
  }
  func.func @transform_2(%arg0: i32, %arg1: i32) -> (i32, i32) {
    %c0_i32 = arith.constant 0 : i32
    %c0_i32_0 = arith.constant 0 : i32
    return %arg0, %c0_i32 : i32, i32
  }
}

</mosaic_0001>

<bundles_post_ra>
// kernel: embedding_forward.1
= control target key start
LH: loop header
LB: loop body
LE: loop exit
PB: predicated region body
PF: predicated region fallthrough
CT: control target
= control target key end

     0   :  { %v211_v2 = vmov 0   ;;  %s261_s0 = inlined_call_operand.vmem [shape: s32[16,1], index: 0, kind: input, shape index: {}]   ;;  %s262_s1 = inlined_call_operand.vmem [shape: f32[32,128], index: 1, kind: input, shape index: {}]   ;;  %s263_s2 = inlined_call_operand.hbm [shape: f32[16,128], index: 2, kind: output, shape index: {}]  }
   0x1   :  { %v18_v0 = vld [vmem:[%s261_s0] sm:$0xff]  ;;  %186 = vset.pattern.permute.xlu0 %v211_v2  ;;  %v40_v3 = vld [vmem:[%s262_s1 + $0x8] sm:$0xff]  ;;  %v41_v4 = vld [vmem:[%s262_s1 + $0x10] sm:$0xff] }
   0x2   :  { %v39_v1 = vld [vmem:[%s262_s1] sm:$0xff]  ;;  %v42_v5 = vld [vmem:[%s262_s1 + $0x18] sm:$0xff]  ;;  %26 = vperm.xlu0 %186, %v18_v0  }
   0x3   :  { %v173_v6 = vpack.c.bf16 %v40_v3, %v39_v1  ;;  %v177_v7 = vpack.c.bf16 %v42_v5, %v41_v4 }
   0x4   :  { %7 = vsyncpa [#allocation4], 0  ;;  %v19_v8 = vld [vmem:[%s261_s0 + $0x8] sm:$0xff]  ;;  %v20_v9 = vlaneseq  ;;  %vm43_vm0 = vcmask 261120   ;;  %v212_v12 = vmov 0.0   ;;  %s213_s1 = smov [#allocation3]  }
   0x5   :  { %174 = vmatprep.subr.bf16.mxu0 %v173_v6  ;;  %s141_s21 = sshll.u32 %s213_s1, 4  ;;  %s142_s21 = int_to_ptr.vmem [resolvable:$true] %s141_s21 }
   0x6   :  { %176 = vmatpush3.bf16.msra.mxu0 %v173_v6  ;;  %29 = vperm.xlu0 %186, %v19_v8   ;;  %v21_v10 = vand.u32 127, %v20_v9  ;;  %s187_s0 = scalar_lea.vmem %s142_s21, 256  ;;  %p192_p1 = scmp.lt.s32.totalorder %s142_s21, %s142_s21 }
   0x7   :  { %178 = vmatprep.subr.bf16.mxu0 %v177_v7  ;;  %p188_p0 = scmp.ne.s32.totalorder %s142_s21, %s187_s0  ;;  %p193_p2 = scmp.lt.s32.totalorder %s187_s0, %s187_s0 }
   0x9   :  { %p194_p3 = por %p193_p2, %p192_p1 }
   0xa   :  { %180 = vmatpush3.bf16.msra.mxu0 %v177_v7 }
   0xb   :  { %p195_p4 = pnand %p194_p3, %p188_p0 }
  0x81   :  { %v27_v11 = vpop.permute.xlu0 %26 }
  0x82   :  { %vm31_vm1 = vcmp.eq.s32.totalorder %v21_v10, %v27_v11 }
  0x83   :  { %v152_v13 = vsel %vm31_vm1, 1.0, %v212_v12 }
  0x84   :  { %170 = vmatprep.mubr.msk.f32.mxu0 %vm43_vm0, %v152_v13 }
  0x85   :  { %v30_v14 = vpop.permute.xlu0 %29 }
  0x86   :  { %vm32_vm2 = vcmp.eq.s32.totalorder %v21_v10, %v30_v14 }
  0x87   :  { %v153_v15 = vsel %vm32_vm2, 1.0, %v212_v12 }
  0x88   :  { %171 = vmatmul.mubr.msk.f32.vlgmr.msra.gmra.mrb[0].mxu0 %vm43_vm0, %v153_v15 }
 0x15b   :  { %v172_v16 = vpop.f32.mrb[0].mxu0 }
 0x15c   :  { %135 = vst [vmem:[#allocation3 + $0x8] sm:$0xff] %v172_v16  ;;  %v116_v17 = vpop.f32.mrb[1].mxu0 }
 0x15d   :  { %134 = vst [vmem:[#allocation3] sm:$0xff] %v116_v17 }
 0x15e   :  { %198 = shalt.err (!%p195_p4)
}
 0x15f   :  { %s199_s24 = scalar_lea.hbm %s263_s2, 256 }
 0x160   :  { %p200_p5 = scmp.ne.s32.totalorder %s263_s2, %s199_s24  ;;  %p203_p6 = scmp.lt.u32.totalorder %s199_s24, %s263_s2 }
 0x162   :  { %p205_p7 = pnand %p203_p6, %p200_p5 }
 0x164   :  { %208 = shalt.err (!%p205_p7)
}
 0x165   :  { %s214_s29 = smov 128   ;;  %s215_s30 = smov 8  }
 0x166   :  { %147 = dma.vmem_to_hbm [thread:$0]  %s142_s21, 256, %s263_s2, [#allocation4], %s214_s29, %s214_s29, %s215_s30  }
 0x167   :  { %209 = dma.done.wait [#allocation4], 256  }
 0x168   :  { %210 = vsyncadd [#allocation4], 4294967040 }
 0x169   :  { %151 = vsyncpa [#allocation4], 1 }

</bundles_post_ra>
